<compile_context>
chip_gen: v5e
topology: v5e:2x2
jax: 0.10.0
libtpu: 0.0.40
codegen_flags: <defaults>
</compile_context>

<pallas_src>
import functools
import math

import jax
import jax.numpy as jnp
from jax.experimental import pallas as pl
from jax.experimental.pallas import tpu as pltpu

MIN_EXPERT_CAPACITY = 4


# ------------------------- per-generation VMEM budget ------------------------

@functools.cache
def _vmem_limit_bytes():
    """Scoped-VMEM limit derived from the physical VMEM of the current chip.

    ~75% of physical capacity (headroom for compiler scratch + double buffers),
    capped at 112 MiB: v5e/v6e (128 MiB physical) -> 96 MiB, v7x (64 MiB) -> 48 MiB.
    """
    try:
        cap = int(pltpu.get_tpu_info().vmem_capacity_bytes)
    except Exception:  # no TPU info available (e.g. interpret mode)
        cap = 64 * 1024 * 1024
    return int(min(cap * 3 // 4, 112 * 1024 * 1024))


# ----------------------------- Pallas kernels ------------------------------

def _gating_kernel(x_ref, w_ref, o_ref):
    # x_ref: (1, TN, D) f32 activations -- cast to bf16 in-kernel so HBM traffic
    #        stays 4 B/elem with no separate cast pass in the wrapper.
    # w_ref: (1, D, G)  bf16 gating weight (pre-converted once at init).
    # o_ref: (1, TN, G) f32  softmax(x @ w) over the gates axis.
    x = x_ref[0].astype(jnp.bfloat16)
    logits = jnp.dot(x, w_ref[0], preferred_element_type=jnp.float32)   # (TN, G)
    m = jnp.max(logits, axis=-1, keepdims=True)
    e = jnp.exp(logits - m)
    s = jnp.sum(e, axis=-1, keepdims=True)
    # approx reciprocal -> EUP slot (kernel is DMA-bound anyway); tiny drift vs f32.
    o_ref[0] = (e * pl.reciprocal(s, approx=True)).astype(o_ref.dtype)


def _pick_token_tiling(n, target):
    """Return (tile, padded_n).  Prefer a tile that divides n (no pad copy)."""
    if n <= target:
        return n, n
    t = max(8, (target // 8) * 8)
    for cand in range(t, 7, -8):
        if n % cand == 0:
            return cand, n
    # No divisor found: pad (costs one extra copy of the activations).
    return t, pl.cdiv(n, t) * t


def _gating_token_target(d, vmem_limit):
    # Keep the double-buffered f32 x tile within ~half of the scoped limit.
    per_row = d * 4
    target = (vmem_limit // 2) // (2 * per_row)
    return max(128, min(2048, (target // 8) * 8))


def gating_softmax(x, w_bf16):
    """softmax(x @ w) over the gates axis, batched over the leading expert axis.

    x: (E, N, D) float32, w_bf16: (E, D, G) bfloat16  ->  (E, N, G) float32.
    """
    E, N, D = x.shape
    G = w_bf16.shape[-1]
    vmem_limit = _vmem_limit_bytes()
    tn, n_pad = _pick_token_tiling(N, _gating_token_target(D, vmem_limit))
    if n_pad != N:
        x = jnp.pad(x, ((0, 0), (0, n_pad - N), (0, 0)))

    out = pl.pallas_call(
        _gating_kernel,
        out_shape=jax.ShapeDtypeStruct((E, n_pad, G), jnp.float32),
        grid=(E, n_pad // tn),
        in_specs=[
            pl.BlockSpec((1, tn, D), lambda e, i: (e, i, 0)),
            pl.BlockSpec((1, D, G), lambda e, i: (e, 0, 0)),
        ],
        out_specs=pl.BlockSpec((1, tn, G), lambda e, i: (e, i, 0)),
        compiler_params=pltpu.CompilerParams(
            dimension_semantics=("parallel", "parallel"),
            vmem_limit_bytes=vmem_limit),
    )(x, w_bf16)
    return out[:, :N, :]


def _expert_ffn_kernel(x_ref, w1_ref, w2_ref, o_ref, acc_ref):
    # x_ref:  (1, TM, D)  f32 (cast to bf16 in-kernel)
    # w1_ref: (1, D,  TH) bf16 (pre-converted at init)
    # w2_ref: (1, TH, D)  bf16
    # o_ref:  (1, TM, D)  bf16
    # acc_ref:(TM, D)     f32 accumulator, resident across the TH reduction axis
    @pl.when(pl.program_id(2) == 0)
    def _():
        acc_ref[...] = jnp.zeros_like(acc_ref)

    x = x_ref[0].astype(jnp.bfloat16)
    h = jnp.dot(x, w1_ref[0], preferred_element_type=jnp.float32)
    h = jnp.maximum(h, 0.0).astype(jnp.bfloat16)   # ReLU, back to bf16 for the MXU
    acc_ref[...] += jnp.dot(h, w2_ref[0], preferred_element_type=jnp.float32)

    @pl.when(pl.program_id(2) == pl.num_programs(2) - 1)
    def _():
        o_ref[0] = acc_ref[...].astype(o_ref.dtype)


def _ffn_tiles(m, d, h, budget):
    """Pick (tm, th).  Prefer fully-resident per-expert weights (th == h) and a
    single token tile (tm == m) so weights stream from HBM once per expert; shrink
    only when the double-buffered VMEM footprint would not fit."""
    def footprint(tm, th):
        x_buf = tm * d * 4          # f32 activations
        w_buf = 2 * th * d * 2      # w1 + w2 tiles (bf16)
        o_buf = tm * d * 2          # bf16 output
        acc = tm * d * 4            # f32 accumulator (single copy)
        h_tmp = tm * th * (4 + 2)   # f32 matmul result + bf16 relu copy
        return 2 * (x_buf + w_buf + o_buf) + acc + h_tmp

    tm_cands = [m] + [c for c in (1024, 512, 256, 128, 64) if c < m]
    th_cands = [h] + [c for c in (4096, 2048, 1024, 512, 256, 128)
                      if c < h and h % c == 0]
    for th in th_cands:
        for tm in tm_cands:
            if footprint(tm, th) <= budget:
                return tm, th
    return tm_cands[-1], th_cands[-1]


def experts_ffn(x, w1_bf16, w2_bf16, *, out_dtype=jnp.bfloat16):
    """Per-(outer, inner)-expert two-layer MLP: relu(x @ w1) @ w2.

    x: (Eo, Ei, M, D) f32; w1: (Eo, Ei, D, H), w2: (Eo, Ei, H, D) in bf16
    (pre-converted once at init).  Output is bf16 (halves writeback + VMEM);
    downstream combine einsums promote back to f32.
    """
    Eo, Ei, M, D = x.shape
    H = w1_bf16.shape[-1]
    # One flattened 'parallel' expert axis (Eo*Ei is even for the default (4,4)
    # config -> balanced 2-TensorCore split on v7x).
    E = Eo * Ei

    vmem_limit = _vmem_limit_bytes()
    tm, th = _ffn_tiles(M, D, H, budget=int(vmem_limit * 0.8))
    m_pad = pl.cdiv(M, tm) * tm

    xf = x.reshape(E, M, D)
    if m_pad != M:
        # Only hit when M has no suitable tile; weights are never padded per-call.
        xf = jnp.pad(xf, ((0, 0), (0, m_pad - M), (0, 0)))
    w1f = w1_bf16.reshape(E, D, H)
    w2f = w2_bf16.reshape(E, H, D)

    n_h = H // th
    # 3-deep weight buffering only pays off when the reduction loop is long.
    w_mode = dict(pipeline_mode=pl.Buffered(3)) if n_h >= 3 else {}

    out = pl.pallas_call(
        _expert_ffn_kernel,
        out_shape=jax.ShapeDtypeStruct((E, m_pad, D), out_dtype),
        grid=(E, m_pad // tm, n_h),
        in_specs=[
            pl.BlockSpec((1, tm, D), lambda e, m, k: (e, m, 0)),
            pl.BlockSpec((1, D, th), lambda e, m, k: (e, 0, k), **w_mode),
            pl.BlockSpec((1, th, D), lambda e, m, k: (e, k, 0), **w_mode),
        ],
        out_specs=pl.BlockSpec((1, tm, D), lambda e, m, k: (e, m, 0)),
        scratch_shapes=[pltpu.VMEM((tm, D), jnp.float32)],
        compiler_params=pltpu.CompilerParams(
            dimension_semantics=("parallel", "parallel", "arbitrary"),
            vmem_limit_bytes=vmem_limit),
    )(xf, w1f, w2f)
    return out[:, :M, :].reshape(Eo, Ei, M, D)


# --------------------------- Gating (JAX glue) ------------------------------

def cumsum_exclusive(t, axis=-2):
    return jnp.cumsum(t, axis=axis) - t


def top1(t):
    return jnp.max(t, axis=-1), jnp.argmax(t, axis=-1)


def top2_gating_post(raw_gates, *, key, importance, capacity_factor,
                     threshold, eps=1e-9):
    """Everything in Top2Gating.forward after raw_gates = softmax(x @ w_gating).

    raw_gates: (..., group_size, num_gates) float32.
    Returns (dispatch, combine, loss, expert_capacity);
    dispatch/combine have shape (..., group_size, num_gates, expert_capacity).
    """
    num_gates = raw_gates.shape[-1]
    group_size = raw_gates.shape[-2]

    gate_1, index_1 = top1(raw_gates)
    mask_1 = jax.nn.one_hot(index_1, num_gates, dtype=jnp.float32)
    density_1_proxy = raw_gates
    if importance is not None:
        equals_one = (importance == 1.0).astype(jnp.float32)
        mask_1 = mask_1 * equals_one[..., None]
        gate_1 = gate_1 * equals_one
        density_1_proxy = density_1_proxy * equals_one[..., None]

    gates_without_top_1 = raw_gates * (1.0 - mask_1)
    gate_2, index_2 = top1(gates_without_top_1)
    mask_2 = jax.nn.one_hot(index_2, num_gates, dtype=jnp.float32)
    if importance is not None:
        greater_zero = (importance > 0.0).astype(jnp.float32)
        mask_2 = mask_2 * greater_zero[..., None]

    denom = gate_1 + gate_2 + eps
    gate_1 = gate_1 / denom
    gate_2 = gate_2 / denom

    density_1 = jnp.mean(mask_1, axis=-2)
    density_1_proxy_m = jnp.mean(density_1_proxy, axis=-2)
    loss = jnp.mean(density_1_proxy_m * density_1) * float(num_gates ** 2)

    # second policy == 'random' (module default).
    # TODO(synk): torch draws probs with the torch RNG (in-place uniform_);
    # same distribution here via jax.random, different random stream.
    probs = jax.random.uniform(key, gate_2.shape, dtype=jnp.float32)
    keep_2 = (probs < gate_2 / max(threshold, eps)).astype(jnp.float32)
    mask_2 = mask_2 * keep_2[..., None]

    expert_capacity = min(group_size,
                          int(group_size * capacity_factor / num_gates))
    expert_capacity = max(expert_capacity, MIN_EXPERT_CAPACITY)
    expert_capacity_f = float(expert_capacity)

    position_in_expert_1 = cumsum_exclusive(mask_1, axis=-2) * mask_1
    mask_1 = mask_1 * (position_in_expert_1 < expert_capacity_f).astype(jnp.float32)
    mask_1_count = jnp.sum(mask_1, axis=-2, keepdims=True)
    mask_1_flat = jnp.sum(mask_1, axis=-1)
    position_in_expert_1 = jnp.sum(position_in_expert_1, axis=-1)
    gate_1 = gate_1 * mask_1_flat

    position_in_expert_2 = cumsum_exclusive(mask_2, axis=-2) + mask_1_count
    position_in_expert_2 = position_in_expert_2 * mask_2
    mask_2 = mask_2 * (position_in_expert_2 < expert_capacity_f).astype(jnp.float32)
    mask_2_flat = jnp.sum(mask_2, axis=-1)
    position_in_expert_2 = jnp.sum(position_in_expert_2, axis=-1)
    gate_2 = gate_2 * mask_2_flat

    oh1 = jax.nn.one_hot(index_1, num_gates, dtype=jnp.float32)
    oh2 = jax.nn.one_hot(index_2, num_gates, dtype=jnp.float32)
    # safe_one_hot: indices >= expert_capacity map to all-zero rows (same as the
    # pad-then-slice trick in the reference).
    pos1_oh = jax.nn.one_hot(position_in_expert_1.astype(jnp.int32),
                             expert_capacity, dtype=jnp.float32)
    pos2_oh = jax.nn.one_hot(position_in_expert_2.astype(jnp.int32),
                             expert_capacity, dtype=jnp.float32)

    combine = (gate_1[..., None, None] * mask_1_flat[..., None, None]
               * oh1[..., None] * pos1_oh[..., None, :]
               + gate_2[..., None, None] * mask_2_flat[..., None, None]
               * oh2[..., None] * pos2_oh[..., None, :])
    dispatch = (combine != 0).astype(combine.dtype)
    return dispatch, combine, loss, expert_capacity


# --------------------------- HeirarchicalMoE --------------------------------

def init_params(key, dim, hidden_dim, eo, ei):
    """Expert and gating weights are stored in bfloat16 (converted ONCE here, not
    per forward), matching the bf16 MXU compute path."""
    k1, k2, k3, k4 = jax.random.split(key, 4)
    std1 = 1.0 / math.sqrt(hidden_dim)   # init_: std = 1/sqrt(last dim)
    std2 = 1.0 / math.sqrt(dim)
    w1 = jax.random.uniform(k1, (eo, ei, dim, hidden_dim),
                            minval=-std1, maxval=std1, dtype=jnp.float32)
    w2 = jax.random.uniform(k2, (eo, ei, hidden_dim, dim),
                            minval=-std2, maxval=std2, dtype=jnp.float32)
    wg_o = jax.random.normal(k3, (dim, eo), dtype=jnp.float32)
    wg_i = jax.random.normal(k4, (eo, dim, ei), dtype=jnp.float32)
    return {
        "w1": w1.astype(jnp.bfloat16),
        "w2": w2.astype(jnp.bfloat16),
        "w_gating_outer": wg_o.astype(jnp.bfloat16),
        "w_gating_inner": wg_i.astype(jnp.bfloat16),
    }


def heirarchical_moe_forward(inputs, params, key, *, eval_mode=True,
                             loss_coef=0.01, threshold=0.2):
    """inputs: (b, n, d) float32.  Returns (output (b, n, d), aux_loss scalar)."""
    b, n, d = inputs.shape
    eo = params["w_gating_outer"].shape[-1]
    ei = params["w_gating_inner"].shape[-1]
    capacity_factor = 2.0 if eval_mode else 1.25
    k_outer, k_inner = jax.random.split(key)

    # ---- outer gating (Pallas matmul+softmax, then routing glue) ----
    raw_outer = gating_softmax(inputs.reshape(1, b * n, d),
                               params["w_gating_outer"][None])
    raw_outer = raw_outer.reshape(b, n, eo)
    dispatch_o, combine_o, loss_o, cap_o = top2_gating_post(
        raw_outer, key=k_outer, importance=None,
        capacity_factor=capacity_factor, threshold=threshold)
    # dispatch_o / combine_o: (b, n, eo, cap_o)

    # TODO(synk): replace the dense one-hot dispatch/combine einsums below with
    # index-based gather/scatter (PrefetchScalarGridSpec) at production scale;
    # these dense (b,n,e,cap) tensors dominate HBM traffic, not the kernels.
    expert_inputs_outer = jnp.einsum("bnd,bnec->ebcd", inputs, dispatch_o)

    importance = jnp.transpose(combine_o, (2, 0, 3, 1)).sum(axis=-1)  # (eo, b, cap_o)
    importance = 0.5 * ((importance > 0.5).astype(jnp.float32)
                        + (importance > 0.0).astype(jnp.float32))

    # ---- inner gating ----
    raw_inner = gating_softmax(expert_inputs_outer.reshape(eo, b * cap_o, d),
                               params["w_gating_inner"])
    raw_inner = raw_inner.reshape(eo, b, cap_o, ei)
    dispatch_i, combine_i, loss_i, cap_i = top2_gating_post(
        raw_inner, key=k_inner, importance=importance,
        capacity_factor=capacity_factor, threshold=threshold)
    # dispatch_i / combine_i: (eo, b, cap_o, ei, cap_i)

    expert_inputs = jnp.einsum("ebnd,ebnfc->efbcd",
                               expert_inputs_outer, dispatch_i)
    orig_shape = expert_inputs.shape                      # (eo, ei, b, cap_i, d)
    expert_inputs_flat = expert_inputs.reshape(eo, ei, -1, d)

    # ---- expert FFN hot path (Pallas, tiled, bf16 MXU / f32 accumulate) ----
    expert_outputs_flat = experts_ffn(expert_inputs_flat,
                                      params["w1"], params["w2"])
    expert_outputs = expert_outputs_flat.reshape(orig_shape)

    # bf16 expert outputs * f32 combine tensors -> f32 results (promotion).
    expert_outputs_outer = jnp.einsum("efbcd,ebnfc->ebnd",
                                      expert_outputs, combine_i)
    output = jnp.einsum("ebcd,bnec->bnd", expert_outputs_outer, combine_o)
    loss = (loss_o + loss_i) * loss_coef
    return output, loss


if __name__ == "__main__":
    b, n, d = 2, 32, 16
    eo, ei = 4, 4
    hidden = 4 * d

    key = jax.random.PRNGKey(0)
    k_params, k_inputs, k_route = jax.random.split(key, 3)

    params = init_params(k_params, d, hidden, eo, ei)
    x = jax.random.normal(k_inputs, (b, n, d), dtype=jnp.float32)

    out, loss = heirarchical_moe_forward(x, params, k_route, eval_mode=True)
    out = jax.block_until_ready(out)
    loss = jax.block_until_ready(loss)

    assert out.shape == (b, n, d)
    assert out.dtype == jnp.float32
    assert loss.shape == ()
    assert bool(jnp.all(jnp.isfinite(out)))
    print("KERNEL_OK")
</pallas_src>

<mosaic_0001>
module attributes {stable_mosaic.version = 11 : i64} {
  func.func @_gating_kernel(%arg0: i32, %arg1: i32, %arg2: memref<1x64x16xf32, #tpu.memory_space<vmem>>, %arg3: memref<1x16x4xbf16, #tpu.memory_space<vmem>>, %arg4: memref<1x64x4xf32, #tpu.memory_space<vmem>>) attributes {dimension_semantics = [#tpu.dimension_semantics<parallel>, #tpu.dimension_semantics<parallel>], iteration_bounds = array<i64: 1, 1>, scalar_prefetch = 0 : i64, scratch_operands = 0 : i64, tpu.core_type = #tpu.core_type<tc>, window_params = [{transform_indices = @transform_0, window_bounds = array<i64: 1, 64, 16>}, {transform_indices = @transform_1, window_bounds = array<i64: 1, 16, 4>}, {transform_indices = @transform_2, window_bounds = array<i64: 1, 64, 4>}]} {
    %c0 = arith.constant 0 : index
    %c0_0 = arith.constant 0 : index
    %c0_1 = arith.constant 0 : index
    %0 = vector.load %arg2[%c0, %c0_0, %c0_1] : memref<1x64x16xf32, #tpu.memory_space<vmem>>, vector<1x64x16xf32>
    %1 = vector.shape_cast %0 : vector<1x64x16xf32> to vector<64x16xf32>
    %2 = arith.truncf %1 : vector<64x16xf32> to vector<64x16xbf16>
    %c0_2 = arith.constant 0 : index
    %c0_3 = arith.constant 0 : index
    %c0_4 = arith.constant 0 : index
    %3 = vector.load %arg3[%c0_2, %c0_3, %c0_4] : memref<1x16x4xbf16, #tpu.memory_space<vmem>>, vector<1x16x4xbf16>
    %4 = vector.shape_cast %3 : vector<1x16x4xbf16> to vector<16x4xbf16>
    %cst = arith.constant dense<0.000000e+00> : vector<64x4xf32>
    %5 = tpu.matmul %2, %4, %cst {dimension_numbers = #tpu.dot_dimension_numbers<[1], [0], [0], [1], [0, 0, 1, 1], [], []>} : vector<64x16xbf16>, vector<16x4xbf16>, vector<64x4xf32> -> vector<64x4xf32>
    %cst_5 = arith.constant dense<0xFF800000> : vector<64xf32>
    %6 = vector.multi_reduction <maximumf>, %5, %cst_5 [1] : vector<64x4xf32> to vector<64xf32>
    %7 = vector.shape_cast %6 : vector<64xf32> to vector<64x1xf32>
    %8 = vector.broadcast %7 : vector<64x1xf32> to vector<64x4xf32>
    %9 = arith.subf %5, %8 : vector<64x4xf32>
    %10 = math.exp %9 : vector<64x4xf32>
    %cst_6 = arith.constant dense<0.000000e+00> : vector<64xf32>
    %11 = vector.multi_reduction <add>, %10, %cst_6 [1] : vector<64x4xf32> to vector<64xf32>
    %12 = vector.shape_cast %11 : vector<64xf32> to vector<64x1xf32>
    %13 = tpu.reciprocal %12 {approx = true} : vector<64x1xf32> -> vector<64x1xf32>
    %14 = vector.broadcast %13 : vector<64x1xf32> to vector<64x4xf32>
    %15 = arith.mulf %10, %14 : vector<64x4xf32>
    %c0_7 = arith.constant 0 : index
    %c0_8 = arith.constant 0 : index
    %c0_9 = arith.constant 0 : index
    %16 = vector.load %arg4[%c0_7, %c0_8, %c0_9] : memref<1x64x4xf32, #tpu.memory_space<vmem>>, vector<1x64x4xf32>
    %17 = vector.shape_cast %16 : vector<1x64x4xf32> to vector<64x4xf32>
    %18 = vector.shape_cast %15 : vector<64x4xf32> to vector<1x64x4xf32>
    tpu.vector_store %arg4[%c0_7, %c0_8, %c0_9], %18 {strides = array<i32>} : memref<1x64x4xf32, #tpu.memory_space<vmem>>, vector<1x64x4xf32>,
    return
  }
  func.func @transform_0(%arg0: i32, %arg1: i32) -> (i32, i32, i32) {
    %c0_i32 = arith.constant 0 : i32
    %c0_i32_0 = arith.constant 0 : i32
    return %arg0, %arg1, %c0_i32 : i32, i32, i32
  }
  func.func @transform_1(%arg0: i32, %arg1: i32) -> (i32, i32, i32) {
    %c0_i32 = arith.constant 0 : i32
    %c0_i32_0 = arith.constant 0 : i32
    %c0_i32_1 = arith.constant 0 : i32
    return %arg0, %c0_i32, %c0_i32_0 : i32, i32, i32
  }
  func.func @transform_2(%arg0: i32, %arg1: i32) -> (i32, i32, i32) {
    %c0_i32 = arith.constant 0 : i32
    %c0_i32_0 = arith.constant 0 : i32
    return %arg0, %arg1, %c0_i32 : i32, i32, i32
  }
}

</mosaic_0001>

<bundles_post_ra>
// kernel: tpu_custom_call.1
= control target key start
LH: loop header
LB: loop body
LE: loop exit
PB: predicated region body
PF: predicated region fallthrough
CT: control target
= control target key end

     0   :  { %vm32_vm0 = vcmask 130048   ;;  %vm74_vm1 = vcmask 31744   ;;  %s309_s1 = inlined_call_operand.vmem [shape: bf16[1,16,4], index: 1, kind: input, shape index: {}]   ;;  %s310_s0 = inlined_call_operand.vmem [shape: f32[1,64,16], index: 0, kind: input, shape index: {}]   ;;  %s311_s2 = inlined_call_operand.vmem [shape: f32[1,64,4], index: 2, kind: output, shape index: {}]  }
   0x1   :  { %v183_v0 = vld [vmem:[%s309_s1] sm:$0xff]  ;;  %v13_v2 = vld [vmem:[%s310_s0 + $0x8] sm:$0xff]  ;;  %v14_v4 = vld [vmem:[%s310_s0 + $0x10] sm:$0xff] }
   0x2   :  { %v12_v1 = vld [vmem:[%s310_s0] sm:$0xff]  ;;  %v15_v5 = vld [vmem:[%s310_s0 + $0x18] sm:$0xff]  ;;  %52 = vmatpush.bf16.msra.mxu0 %v183_v0  ;;  %184 = vmatpush.bf16.msra.mxu1 %v183_v0  ;;  %v17_v8 = vld [vmem:[%s310_s0 + $0x28] sm:$0xff] }
   0x3   :  { %v20_v3 = vpack.c.bf16 %v13_v2, %v12_v1  ;;  %v16_v6 = vld [vmem:[%s310_s0 + $0x20] sm:$0xff]  ;;  %v21_v7 = vpack.c.bf16 %v15_v5, %v14_v4  ;;  %v18_v9 = vld [vmem:[%s310_s0 + $0x30] sm:$0xff]  ;;  %v19_v10 = vld [vmem:[%s310_s0 + $0x38] sm:$0xff]  ;;  %185 = vmatpush.bf16.msra.mxu2 %v183_v0  ;;  %186 = vmatpush.bf16.msra.mxu3 %v183_v0 }
   0x4   :  { %v22_v11 = vpack.c.bf16 %v17_v8, %v16_v6  ;;  %v23_v12 = vpack.c.bf16 %v19_v10, %v18_v9 }
   0x5   :  { %179 = vmatmul.msk.bf16.vlgmr.msra.gmra.mxu0 %vm32_vm0, %v20_v3  ;;  %180 = vmatmul.msk.bf16.vlgmr.msra.gmra.mxu1 %vm32_vm0, %v21_v7 }
   0x6   :  { %181 = vmatmul.msk.bf16.vlgmr.msra.gmra.mxu2 %vm32_vm0, %v22_v11  ;;  %182 = vmatmul.msk.bf16.vlgmr.msra.gmra.mxu3 %vm32_vm0, %v23_v12 }
  0x82   :  { %v54_v13 = vpop.f32.mrf.mxu0  ;;  %v59_v14 = vpop.f32.mrf.mxu1 }
  0x83   :  { %v81_v15 = vsel %vm74_vm1, %v59_v14, -inf  ;;  %v75_v16 = vsel %vm74_vm1, %v54_v13, -inf }
  0x84   :  { %82 = vmax.xlane.f32.xlu1 %v81_v15  ;;  %76 = vmax.xlane.f32.xlu0 %v75_v16 }
  0x89   :  { %v64_v17 = vpop.f32.mrf.mxu2  ;;  %v69_v18 = vpop.f32.mrf.mxu3 }
  0x8a   :  { %v87_v19 = vsel %vm74_vm1, %v64_v17, -inf  ;;  %v56_v20 = vpop.f32.mrf.mxu0  ;;  %v61_v21 = vpop.f32.mrf.mxu1  ;;  %v93_v28 = vsel %vm74_vm1, %v69_v18, -inf }
  0x8b   :  { %88 = vmax.xlane.f32.xlu2 %v87_v19  ;;  %v84_v22 = vsel %vm74_vm1, %v61_v21, -inf  ;;  %v78_v23 = vsel %vm74_vm1, %v56_v20, -inf }
  0x8c   :  { %85 = vmax.xlane.f32.xlu1 %v84_v22  ;;  %79 = vmax.xlane.f32.xlu0 %v78_v23 }
  0x91   :  { %v66_v24 = vpop.f32.mrf.mxu2  ;;  %v71_v25 = vpop.f32.mrf.mxu3 }
  0x92   :  { %v90_v26 = vsel %vm74_vm1, %v66_v24, -inf  ;;  %v96_v27 = vsel %vm74_vm1, %v71_v25, -inf }
  0x93   :  { %91 = vmax.xlane.f32.xlu2 %v90_v26 }
  0x94   :  { %97 = vmax.xlane.f32.xlu1 %v96_v27  ;;  %94 = vmax.xlane.f32.xlu0 %v93_v28 }
  0xf7   :  { %v83_v29 = vpop.xlane.xlu1 %82  ;;  %v77_v30 = vpop.xlane.xlu0 %76 }
  0xf8   :  { %v101_v31 = vsub.f32 %v59_v14, %v83_v29  ;;  %v99_v32 = vsub.f32 %v54_v13, %v77_v30 }
  0xfa   :  { %v111_v33 = vmul.f32 1.442695, %v101_v31  ;;  %v107_v34 = vmul.f32 1.442695, %v99_v32 }
  0xfc   :  { %187 = vpow2.f32 %v111_v33 }
  0xfd   :  { %189 = vpow2.f32 %v107_v34 }
  0xfe   :  { %v89_v35 = vpop.xlane.xlu2 %88 }
  0xff   :  { %v103_v36 = vsub.f32 %v64_v17, %v89_v35  ;;  %v86_v37 = vpop.xlane.xlu1 %85  ;;  %v80_v38 = vpop.xlane.xlu0 %79 }
 0x100   :  { %v102_v39 = vsub.f32 %v61_v21, %v86_v37  ;;  %v100_v41 = vsub.f32 %v56_v20, %v80_v38 }
 0x101   :  { %v115_v40 = vmul.f32 1.442695, %v103_v36 }
 0x102   :  { %v188_v42 = vpop.eup %187  ;;  %v113_v43 = vmul.f32 1.442695, %v102_v39  ;;  %v109_v47 = vmul.f32 1.442695, %v100_v41 }
 0x103   :  { %v190_v44 = vpop.eup %189  ;;  %191 = vpow2.f32 %v115_v40  ;;  %v129_v45 = vsel %vm74_vm1, %v188_v42, 0.0 }
 0x104   :  { %193 = vpow2.f32 %v113_v43  ;;  %130 = vadd.xlane.f32.xlu1 %v129_v45  ;;  %v123_v46 = vsel %vm74_vm1, %v190_v44, 0.0 }
 0x105   :  { %124 = vadd.xlane.f32.xlu2 %v123_v46  ;;  %195 = vpow2.f32 %v109_v47 }
 0x106   :  { %v92_v48 = vpop.xlane.xlu2 %91 }
 0x107   :  { %v104_v49 = vsub.f32 %v66_v24, %v92_v48  ;;  %v98_v50 = vpop.xlane.xlu1 %97  ;;  %v95_v51 = vpop.xlane.xlu0 %94 }
 0x108   :  { %v105_v52 = vsub.f32 %v69_v18, %v95_v51  ;;  %v106_v55 = vsub.f32 %v71_v25, %v98_v50 }
 0x109   :  { %v192_v53 = vpop.eup %191  ;;  %v117_v54 = vmul.f32 1.442695, %v104_v49 }
 0x10a   :  { %v194_v56 = vpop.eup %193  ;;  %v119_v57 = vmul.f32 1.442695, %v105_v52  ;;  %v135_v58 = vsel %vm74_vm1, %v192_v53, 0.0  ;;  %v121_v60 = vmul.f32 1.442695, %v106_v55 }
 0x10b   :  { %197 = vpow2.f32 %v117_v54  ;;  %136 = vadd.xlane.f32.xlu0 %v135_v58  ;;  %v132_v59 = vsel %vm74_vm1, %v194_v56, 0.0  ;;  %v196_v61 = vpop.eup %195 }
 0x10c   :  { %199 = vpow2.f32 %v119_v57  ;;  %v126_v0 = vsel %vm74_vm1, %v196_v61, 0.0 }
 0x10d   :  { %133 = vadd.xlane.f32.xlu2 %v132_v59  ;;  %201 = vpow2.f32 %v121_v60 }
 0x111   :  { %v198_v62 = vpop.eup %197 }
 0x112   :  { %v138_v63 = vsel %vm74_vm1, %v198_v62, 0.0  ;;  %v200_v1 = vpop.eup %199 }
 0x113   :  { %139 = vadd.xlane.f32.xlu1 %v138_v63  ;;  %127 = vadd.xlane.f32.xlu0 %v126_v0  ;;  %v141_v2 = vsel %vm74_vm1, %v200_v1, 0.0  ;;  %v202_v3 = vpop.eup %201 }
 0x114   :  { %v144_v4 = vsel %vm74_vm1, %v202_v3, 0.0 }
 0x115   :  { %142 = vadd.xlane.f32.xlu2 %v141_v2 }
 0x11b   :  { %145 = vadd.xlane.f32.xlu0 %v144_v4 }
 0x177   :  { %v131_v5 = vpop.xlane.xlu1 %130 }
 0x178   :  { %203 = vrcp.f32 %v131_v5  ;;  %v125_v6 = vpop.xlane.xlu2 %124 }
 0x179   :  { %205 = vrcp.f32 %v125_v6 }
 0x17e   :  { %v204_v7 = vpop.eup %203  ;;  %v137_v8 = vpop.xlane.xlu0 %136 }
 0x17f   :  { %v206_v9 = vpop.eup %205  ;;  %v157_v10 = vmul.f32 %v204_v7, %v188_v42  ;;  %207 = vrcp.f32 %v137_v8 }
 0x180   :  { %v155_v11 = vmul.f32 %v206_v9, %v190_v44  ;;  %v134_v12 = vpop.xlane.xlu2 %133 }
 0x181   :  { %165 = vst.msk [vmem:[%s311_s2 + $0x10] sm:$0xff] %vm74_vm1, %v157_v10  ;;  %209 = vrcp.f32 %v134_v12 }
 0x182   :  { %163 = vst.msk [vmem:[%s311_s2] sm:$0xff] %vm74_vm1, %v155_v11 }
 0x185   :  { %v208_v13 = vpop.eup %207 }
 0x186   :  { %v159_v14 = vmul.f32 %v208_v13, %v192_v53  ;;  %v140_v15 = vpop.xlane.xlu1 %139  ;;  %v128_v16 = vpop.xlane.xlu0 %127 }
 0x187   :  { %v210_v17 = vpop.eup %209  ;;  %211 = vrcp.f32 %v140_v15 }
 0x188   :  { %167 = vst.msk [vmem:[%s311_s2 + $0x20] sm:$0xff] %vm74_vm1, %v159_v14  ;;  %v158_v18 = vmul.f32 %v210_v17, %v194_v56  ;;  %213 = vrcp.f32 %v128_v16  ;;  %v143_v19 = vpop.xlane.xlu2 %142 }
 0x189   :  { %215 = vrcp.f32 %v143_v19 }
 0x18a   :  { %166 = vst.msk [vmem:[%s311_s2 + $0x18] sm:$0xff] %vm74_vm1, %v158_v18 }
 0x18d   :  { %v212_v20 = vpop.eup %211 }
 0x18e   :  { %v214_v21 = vpop.eup %213  ;;  %v160_v22 = vmul.f32 %v212_v20, %v198_v62  ;;  %v146_v23 = vpop.xlane.xlu0 %145 }
 0x18f   :  { %v216_v24 = vpop.eup %215  ;;  %v156_v25 = vmul.f32 %v214_v21, %v196_v61  ;;  %217 = vrcp.f32 %v146_v23 }
 0x190   :  { %168 = vst.msk [vmem:[%s311_s2 + $0x28] sm:$0xff] %vm74_vm1, %v160_v22  ;;  %v161_v26 = vmul.f32 %v216_v24, %v200_v1 }
 0x191   :  { %164 = vst.msk [vmem:[%s311_s2 + $0x8] sm:$0xff] %vm74_vm1, %v156_v25 }
 0x192   :  { %169 = vst.msk [vmem:[%s311_s2 + $0x30] sm:$0xff] %vm74_vm1, %v161_v26 }
 0x195   :  { %v218_v27 = vpop.eup %217 }
 0x196   :  { %v162_v28 = vmul.f32 %v218_v27, %v202_v3 }
 0x198   :  { %170 = vst.msk [vmem:[%s311_s2 + $0x38] sm:$0xff] %vm74_vm1, %v162_v28 }

</bundles_post_ra>
